<compile_context>
chip_gen: v6e
topology: v6e:2x2x1
jax: 0.10.0
libtpu: 0.0.40
codegen_flags: <defaults>
</compile_context>

<pallas_src>
import jax
import jax.numpy as jnp
from jax.experimental import pallas as pl
from jax.experimental.pallas import tpu as pltpu

_EPS_BN = 1e-5
_EPS_NORM = 1e-12


def _nae_kernel(x_ref, w_ref, params_ref, rs_ref, emb_ref, logit_ref):
    # x:      (B, C) f32  -> cast to bf16 in-kernel just before the MXU op.
    # w:      (D, C) bf16 exactly as stored by nn.Linear (no transpose).
    # params: (2, D) f32  = [gamma; beta] packed into one DMA.
    # rs:     (2,)  f32 in SMEM = [rescaler_weight, rescaler_bias].
    x = x_ref[...].astype(jnp.bfloat16)
    w = w_ref[...]

    # --- Linear: x @ W^T on the MXU (bf16 operands, f32 accumulate).
    #     Bias omitted: training-mode BN mean-subtraction cancels it exactly.
    y = jax.lax.dot_general(
        x, w, (((1,), (1,)), ((), ())),
        preferred_element_type=jnp.float32)                        # (B, D) f32

    # --- BatchNorm1d(D), training mode: batch mean / biased var (f32) ---
    mean = jnp.mean(y, axis=0, keepdims=True)
    cy = y - mean
    var = jnp.mean(cy * cy, axis=0, keepdims=True)
    gamma = params_ref[0:1, :]                                     # (1, D)
    beta = params_ref[1:2, :]                                      # (1, D)
    scale = gamma * jax.lax.rsqrt(var + _EPS_BN)   # fold gamma -> one (B,D) mul
    e = cy * scale + beta

    # --- L2 normalize: single EUP rsqrt on the clamped squared norm ---
    sq = e * e
    ssq = jnp.sum(sq, axis=1, keepdims=True)                       # (B, 1)
    inv = jax.lax.rsqrt(jnp.maximum(ssq, _EPS_NORM * _EPS_NORM))
    emb_ref[...] = (e * inv).astype(emb_ref.dtype)

    # Lane-dense (1, B) row of norms via a tiny MXU contraction (the MXU is
    # idle after the main matmul; avoids an XLU transpose of a (B, 1) tile).
    ssq_row = jax.lax.dot_general(
        jnp.ones((1, e.shape[1]), jnp.float32), sq,
        (((1,), (1,)), ((), ())),
        preferred_element_type=jnp.float32)                        # (1, B)
    norms_row = jnp.sqrt(ssq_row)

    # --- rescaler BatchNorm1d(1), training mode; scalars from SMEM ---
    nmean = jnp.mean(norms_row)
    ncent = norms_row - nmean
    nvar = jnp.mean(ncent * ncent)
    logits = ncent * jax.lax.rsqrt(nvar + _EPS_BN) * rs_ref[0] + rs_ref[1]
    logit_ref[...] = logits.astype(logit_ref.dtype)                # (1, B)


def norm_aware_embedding_proj(x, w, b, gamma, beta, rescaler_w, rescaler_b):
    """x: (B, C) or (B, C, 1, 1). w: (D, C) as stored by nn.Linear (NOT transposed).
    Returns (embeddings (B, D) f32, logits (B,) f32)."""
    if x.ndim == 4:
        assert x.shape[2] == 1 and x.shape[3] == 1
        x = x.reshape(x.shape[0], x.shape[1])
    B, C = x.shape
    D = w.shape[0]

    # Linear bias b is mathematically cancelled by the training-mode BN mean
    # subtraction, so it never reaches the kernel (kept in the signature for
    # interface parity with the PyTorch module).
    del b

    vmem = pl.BlockSpec(memory_space=pltpu.MemorySpace.VMEM)
    smem = pl.BlockSpec(memory_space=pltpu.MemorySpace.SMEM)

    params = jnp.stack([
        jnp.asarray(gamma, jnp.float32).reshape(D),
        jnp.asarray(beta, jnp.float32).reshape(D),
    ])                                                   # (2, D) f32
    rescaler = jnp.stack([
        jnp.asarray(rescaler_w, jnp.float32).reshape(()),
        jnp.asarray(rescaler_b, jnp.float32).reshape(()),
    ])                                                   # (2,)  SMEM scalars

    # HBM bytes actually touched (for the scheduler hint).
    bytes_accessed = (B * C * 4 + D * C * 2 + 2 * D * 4 + 2 * 4
                      + B * D * 4 + B * 4)
    # VMEM footprint: inputs/outputs plus the major live f32 intermediates
    # (y, cy, e, sq) and the bf16 copy of x, with 2x headroom, >= 4 MiB.
    approx_vmem = (B * C * 4 + D * C * 2 + 2 * D * 4
                   + B * D * 4 + B * 4
                   + 4 * B * D * 4 + B * C * 2)
    vmem_limit = int(min(max(2 * approx_vmem, 4 * 1024 * 1024),
                         64 * 1024 * 1024))

    emb, logits_row = pl.pallas_call(
        _nae_kernel,
        out_shape=(jax.ShapeDtypeStruct((B, D), jnp.float32),
                   jax.ShapeDtypeStruct((1, B), jnp.float32)),
        in_specs=[vmem, vmem, vmem, smem],
        out_specs=(vmem, vmem),
        compiler_params=pltpu.CompilerParams(vmem_limit_bytes=vmem_limit),
        cost_estimate=pl.CostEstimate(
            flops=2 * B * C * D + 2 * B * D,
            transcendentals=2 * B + D + 1,
            bytes_accessed=bytes_accessed),
    )(
        x.astype(jnp.float32),                   # (B, C) f32; cast in-kernel
        w.astype(jnp.bfloat16),                  # (D, C) bf16, no transpose
        params,                                  # (2, D) f32 [gamma; beta]
        rescaler,                                # (2,)  SMEM
    )
    return emb, logits_row.reshape(B)            # .squeeze() of the norms


def _reference(x, w, b, gamma, beta, rescaler_w, rescaler_b):
    """Pure-JAX f32 reference mirroring the PyTorch module in training mode."""
    x2 = x.reshape(x.shape[0], -1).astype(jnp.float32)
    w32 = w.astype(jnp.float32)
    y = x2 @ w32.T + b.astype(jnp.float32)
    mean = y.mean(axis=0, keepdims=True)
    var = ((y - mean) ** 2).mean(axis=0, keepdims=True)
    e = (y - mean) / jnp.sqrt(var + _EPS_BN) * gamma + beta
    n = jnp.sqrt((e * e).sum(axis=1, keepdims=True))
    emb = e / jnp.clip(n, _EPS_NORM)
    nm = n.mean()
    nv = ((n - nm) ** 2).mean()
    logits = ((n - nm) / jnp.sqrt(nv + _EPS_BN)
              * rescaler_w + rescaler_b).reshape(-1)
    return emb, logits


if __name__ == "__main__":
    # Small synthetic config: featmap 'feat_res5' of shape (B, C, 1, 1), dim=D.
    B, C, D = 8, 256, 128

    key = jax.random.PRNGKey(0)
    k_x, k_w, k_g = jax.random.split(key, 3)

    # Deterministic parameter init matching the module's __init__:
    #   Linear:     weight ~ N(0, 0.01), bias = 0
    #   BatchNorm:  weight ~ N(0, 0.01), bias = 0
    #   rescaler:   BatchNorm1d(1) default init -> weight = 1, bias = 0
    x = jax.random.normal(k_x, (B, C, 1, 1), dtype=jnp.float32)
    lin_w = 0.01 * jax.random.normal(k_w, (D, C), dtype=jnp.float32)
    lin_b = jnp.zeros((D,), dtype=jnp.float32)
    bn_gamma = 0.01 * jax.random.normal(k_g, (D,), dtype=jnp.float32)
    bn_beta = jnp.zeros((D,), dtype=jnp.float32)
    rescaler_w = jnp.ones((), dtype=jnp.float32)
    rescaler_b = jnp.zeros((), dtype=jnp.float32)

    # Parameter-init-time dtype choice: the projection weight is stored bf16
    # once, rather than being cast (or transposed) on every forward call.
    lin_w_bf16 = lin_w.astype(jnp.bfloat16)

    emb, logits = norm_aware_embedding_proj(
        x, lin_w_bf16, lin_b, bn_gamma, bn_beta, rescaler_w, rescaler_b)
    jax.block_until_ready((emb, logits))

    assert emb.shape == (B, D) and logits.shape == (B,)
    assert bool(jnp.all(jnp.isfinite(emb))) and bool(jnp.all(jnp.isfinite(logits)))
    # Embeddings are L2-normalized rows.
    row_norms = jnp.sqrt(jnp.sum(emb * emb, axis=1))
    assert bool(jnp.all(jnp.abs(row_norms - 1.0) < 1e-2))

    # Compare against a pure-JAX f32 reference (same bf16-stored weight, so the
    # only deltas are the in-kernel bf16 activation cast + f32 accumulation).
    ref_emb, ref_logits = _reference(
        x, lin_w_bf16, lin_b, bn_gamma, bn_beta, rescaler_w, rescaler_b)
    assert bool(jnp.max(jnp.abs(emb - ref_emb)) < 2e-2)
    assert bool(jnp.max(jnp.abs(logits - ref_logits)) < 1.5e-1)
    print("KERNEL_OK")
</pallas_src>

<mosaic_0001>
module attributes {stable_mosaic.version = 11 : i64} {
  func.func @_nae_kernel(%arg0: memref<8x256xf32, #tpu.memory_space<vmem>>, %arg1: memref<128x256xbf16, #tpu.memory_space<vmem>>, %arg2: memref<2x128xf32, #tpu.memory_space<vmem>>, %arg3: memref<2xf32, #tpu.memory_space<smem>>, %arg4: memref<8x128xf32, #tpu.memory_space<vmem>>, %arg5: memref<1x8xf32, #tpu.memory_space<vmem>>) attributes {dimension_semantics = [], scalar_prefetch = 0 : i64, scratch_operands = 0 : i64, tpu.core_type = #tpu.core_type<tc>} {
    %c0 = arith.constant 0 : index
    %c0_0 = arith.constant 0 : index
    %0 = vector.load %arg0[%c0, %c0_0] : memref<8x256xf32, #tpu.memory_space<vmem>>, vector<8x256xf32>
    %1 = arith.truncf %0 : vector<8x256xf32> to vector<8x256xbf16>
    %c0_1 = arith.constant 0 : index
    %c0_2 = arith.constant 0 : index
    %2 = vector.load %arg1[%c0_1, %c0_2] : memref<128x256xbf16, #tpu.memory_space<vmem>>, vector<128x256xbf16>
    %cst = arith.constant dense<0.000000e+00> : vector<8x128xf32>
    %3 = tpu.matmul %1, %2, %cst {dimension_numbers = #tpu.dot_dimension_numbers<[1], [1], [0], [0], [0, 0, 1, 0], [], []>} : vector<8x256xbf16>, vector<128x256xbf16>, vector<8x128xf32> -> vector<8x128xf32>
    %cst_3 = arith.constant dense<0.000000e+00> : vector<128xf32>
    %4 = vector.multi_reduction <add>, %3, %cst_3 [0] : vector<8x128xf32> to vector<128xf32>
    %5 = vector.shape_cast %4 : vector<128xf32> to vector<1x128xf32>
    %cst_4 = arith.constant 8.000000e+00 : f32
    %6 = vector.broadcast %cst_4 : f32 to vector<1x128xf32>
    %7 = arith.divf %5, %6 : vector<1x128xf32>
    %8 = vector.broadcast %7 : vector<1x128xf32> to vector<8x128xf32>
    %9 = arith.subf %3, %8 : vector<8x128xf32>
    %10 = arith.mulf %9, %9 : vector<8x128xf32>
    %cst_5 = arith.constant dense<0.000000e+00> : vector<128xf32>
    %11 = vector.multi_reduction <add>, %10, %cst_5 [0] : vector<8x128xf32> to vector<128xf32>
    %12 = vector.shape_cast %11 : vector<128xf32> to vector<1x128xf32>
    %cst_6 = arith.constant 8.000000e+00 : f32
    %13 = vector.broadcast %cst_6 : f32 to vector<1x128xf32>
    %14 = arith.divf %12, %13 : vector<1x128xf32>
    %c0_7 = arith.constant 0 : index
    %c0_8 = arith.constant 0 : index
    %15 = vector.load %arg2[%c0_7, %c0_8] : memref<2x128xf32, #tpu.memory_space<vmem>>, vector<1x128xf32>
    %c1 = arith.constant 1 : index
    %c0_9 = arith.constant 0 : index
    %16 = vector.load %arg2[%c1, %c0_9] : memref<2x128xf32, #tpu.memory_space<vmem>>, vector<1x128xf32>
    %cst_10 = arith.constant 9.99999974E-6 : f32
    %17 = vector.broadcast %cst_10 : f32 to vector<1x128xf32>
    %18 = arith.addf %14, %17 : vector<1x128xf32>
    %19 = math.rsqrt %18 : vector<1x128xf32>
    %20 = arith.mulf %15, %19 : vector<1x128xf32>
    %21 = vector.broadcast %20 : vector<1x128xf32> to vector<8x128xf32>
    %22 = arith.mulf %9, %21 : vector<8x128xf32>
    %23 = vector.broadcast %16 : vector<1x128xf32> to vector<8x128xf32>
    %24 = arith.addf %22, %23 : vector<8x128xf32>
    %25 = arith.mulf %24, %24 : vector<8x128xf32>
    %cst_11 = arith.constant dense<0.000000e+00> : vector<8xf32>
    %26 = vector.multi_reduction <add>, %25, %cst_11 [1] : vector<8x128xf32> to vector<8xf32>
    %27 = vector.shape_cast %26 : vector<8xf32> to vector<8x1xf32>
    %cst_12 = arith.constant 1.000000e-24 : f32
    %28 = vector.broadcast %cst_12 : f32 to vector<8x1xf32>
    %29 = arith.maximumf %27, %28 : vector<8x1xf32>
    %30 = math.rsqrt %29 : vector<8x1xf32>
    %31 = vector.broadcast %30 : vector<8x1xf32> to vector<8x128xf32>
    %32 = arith.mulf %24, %31 : vector<8x128xf32>
    %c0_13 = arith.constant 0 : index
    %c0_14 = arith.constant 0 : index
    %33 = vector.load %arg4[%c0_13, %c0_14] : memref<8x128xf32, #tpu.memory_space<vmem>>, vector<8x128xf32>
    tpu.vector_store %arg4[%c0_13, %c0_14], %32 {strides = array<i32>} : memref<8x128xf32, #tpu.memory_space<vmem>>, vector<8x128xf32>,
    %cst_15 = arith.constant 1.000000e+00 : f32
    %34 = vector.broadcast %cst_15 : f32 to vector<1x128xf32>
    %cst_16 = arith.constant dense<0.000000e+00> : vector<1x8xf32>
    %35 = tpu.matmul %34, %25, %cst_16 {dimension_numbers = #tpu.dot_dimension_numbers<[1], [1], [0], [0], [0, 0, 1, 0], [], []>} : vector<1x128xf32>, vector<8x128xf32>, vector<1x8xf32> -> vector<1x8xf32>
    %36 = math.sqrt %35 : vector<1x8xf32>
    %37 = vector.shape_cast %36 : vector<1x8xf32> to vector<1x1x8xf32>
    %cst_17 = arith.constant dense<0.000000e+00> : vector<1xf32>
    %38 = vector.multi_reduction <add>, %37, %cst_17 [1, 2] : vector<1x1x8xf32> to vector<1xf32>
    %39 = vector.shape_cast %38 : vector<1xf32> to vector<1x1x1xf32>
    %40 = vector.extract %39[0, 0, 0] : f32 from vector<1x1x1xf32>
    %cst_18 = arith.constant 8.000000e+00 : f32
    %41 = arith.divf %40, %cst_18 : f32
    %42 = vector.broadcast %41 : f32 to vector<1x8xf32>
    %43 = arith.subf %36, %42 : vector<1x8xf32>
    %44 = arith.mulf %43, %43 : vector<1x8xf32>
    %45 = vector.shape_cast %44 : vector<1x8xf32> to vector<1x1x8xf32>
    %cst_19 = arith.constant dense<0.000000e+00> : vector<1xf32>
    %46 = vector.multi_reduction <add>, %45, %cst_19 [1, 2] : vector<1x1x8xf32> to vector<1xf32>
    %47 = vector.shape_cast %46 : vector<1xf32> to vector<1x1x1xf32>
    %48 = vector.extract %47[0, 0, 0] : f32 from vector<1x1x1xf32>
    %cst_20 = arith.constant 8.000000e+00 : f32
    %49 = arith.divf %48, %cst_20 : f32
    %cst_21 = arith.constant 9.99999974E-6 : f32
    %50 = arith.addf %49, %cst_21 : f32
    %51 = math.rsqrt %50 : f32
    %52 = vector.broadcast %51 : f32 to vector<1x8xf32>
    %53 = arith.mulf %43, %52 : vector<1x8xf32>
    %c0_22 = arith.constant 0 : index
    %54 = memref.load %arg3[%c0_22] : memref<2xf32, #tpu.memory_space<smem>>
    %55 = vector.broadcast %54 : f32 to vector<1x8xf32>
    %56 = arith.mulf %53, %55 : vector<1x8xf32>
    %c1_23 = arith.constant 1 : index
    %57 = memref.load %arg3[%c1_23] : memref<2xf32, #tpu.memory_space<smem>>
    %58 = vector.broadcast %57 : f32 to vector<1x8xf32>
    %59 = arith.addf %56, %58 : vector<1x8xf32>
    %c0_24 = arith.constant 0 : index
    %c0_25 = arith.constant 0 : index
    %60 = vector.load %arg5[%c0_24, %c0_25] : memref<1x8xf32, #tpu.memory_space<vmem>>, vector<1x8xf32>
    tpu.vector_store %arg5[%c0_24, %c0_25], %59 {strides = array<i32>} : memref<1x8xf32, #tpu.memory_space<vmem>>, vector<1x8xf32>,
    return
  }
}

</mosaic_0001>

<bundles_post_ra>
// kernel: tpu_custom_call.1
= control target key start
LH: loop header
LB: loop body
LE: loop exit
PB: predicated region body
PF: predicated region fallthrough
CT: control target
= control target key end

     0   :  { %11 = vsyncpa [#allocation3], 0  ;;  %s630_s0 = inlined_call_operand.hbm [shape: f32[8,256], index: 0, kind: input, shape index: {}]   ;;  %s631_s1 = inlined_call_operand.hbm [shape: bf16[128,256], index: 1, kind: input, shape index: {}]   ;;  %s632_s2 = inlined_call_operand.vmem [shape: f32[2,128], index: 2, kind: input, shape index: {}]   ;;  %s633_s3 = inlined_call_operand.vmem [shape: f32[2], index: 3, kind: input, shape index: {}]   ;;  %s634_s4 = inlined_call_operand.hbm [shape: f32[8,128], index: 4, kind: output, shape index: {0}]   ;;  %s635_s5 = inlined_call_operand.hbm [shape: f32[1,8], index: 5, kind: output, shape index: {1}]  }
   0x1   :  { %12 = vsyncpa [#allocation7], 0 }
   0x2   :  { %13 = vsyncpa [#allocation5], 0 }
   0x3   :  { %14 = vsyncpa [#allocation4], 0 }
   0x4   :  { %15 = vsyncpa [#allocation11], 0  ;;  %s566_s18 = smov [#allocation2]   ;;  %s567_s20 = smov [#allocation6]  }
   0x5   :  { %s22_s19 = sshll.u32 %s566_s18, 4  ;;  %s31_s21 = sshll.u32 %s567_s20, 4  ;;  %s23_s19 = int_to_ptr.vmem [resolvable:$true] %s22_s19  ;;  %s32_s21 = int_to_ptr.vmem [resolvable:$true] %s31_s21 }
   0x6   :  { %s472_s22 = scalar_lea.vmem %s23_s19, 256  ;;  %p477_p1 = scmp.lt.s32.totalorder %s23_s19, %s23_s19 }
   0x7   :  { %p473_p0 = scmp.ne.s32.totalorder %s23_s19, %s472_s22  ;;  %p478_p2 = scmp.lt.s32.totalorder %s472_s22, %s472_s22 }
   0x9   :  { %p479_p3 = por %p478_p2, %p477_p1 }
   0xb   :  { %p480_p4 = pnand %p479_p3, %p473_p0 }
   0xd   :  { %483 = shalt.err (!%p480_p4)
}
   0xe   :  { %25 = dma.hbm_to_vmem [thread:$0]  %s630_s0, 256, %s23_s19, [#allocation3]  }
   0xf   :  { %s492_s25 = scalar_lea.vmem %s32_s21, 2048  ;;  %p497_p6 = scmp.lt.s32.totalorder %s32_s21, %s32_s21 }
  0x10   :  { %p493_p5 = scmp.ne.s32.totalorder %s32_s21, %s492_s25  ;;  %p498_p7 = scmp.lt.s32.totalorder %s492_s25, %s492_s25 }
  0x12   :  { %p499_p8 = por %p498_p7, %p497_p6 }
  0x14   :  { %p500_p9 = pnand %p499_p8, %p493_p5 }
  0x16   :  { %503 = shalt.err (!%p500_p9)
}
  0x17   :  { %s568_s26 = smov 128   ;;  %s569_s27 = smov 8  }
  0x18   :  { %37 = dma.hbm_to_vmem [thread:$0]  %s631_s1, 2048, %s32_s21, [#allocation7], %s568_s26, %s568_s26, %s569_s27  }
  0x19   :  { %s46_s7 = sshll.u32 %s633_s3, 4  ;;  %s47_s7 = int_to_ptr.vmem [resolvable:$true] %s46_s7 }
  0x1a   :  { %s504_s8 = scalar_lea.vmem %s47_s7, 16  ;;  %p509_p11 = scmp.lt.s32.totalorder %s47_s7, %s47_s7 }
  0x1b   :  { %p505_p10 = scmp.ne.s32.totalorder %s47_s7, %s504_s8  ;;  %p510_p12 = scmp.lt.s32.totalorder %s504_s8, %s504_s8 }
  0x1d   :  { %p511_p13 = por %p510_p12, %p509_p11 }
  0x1f   :  { %p512_p0 = pnand %p511_p13, %p505_p10 }
  0x21   :  { %515 = shalt.err (!%p512_p0)
}
  0x22   :  { %s570_s0 = smov [#allocation8]  }
  0x23   :  { %49 = dma.vmem_to_smem %s47_s7, 16, %s570_s0, [#allocation5]  }
  0x24   :  { %556 = dma.done.wait [#allocation3], 256  }
  0x25   :  { %557 = vsyncadd [#allocation3], 4294967040 }
  0x26   :  { %558 = dma.done.wait [#allocation7], 2048  }
  0x27   :  { %559 = vsyncadd [#allocation7], 4294965248 }
  0x28   :  { %560 = dma.done.wait [#allocation5], 16  }
  0x29   :  { %561 = vsyncadd [#allocation5], 4294967280 }
  0x2a   :  { %59 = sfence }
  0x2b   :  { %v432_v0 = vld [vmem:[#allocation6 + $0x74] ss:$8 sps:$4 sm:$0xff]   ;;  %v434_v1 = vld [vmem:[#allocation6 + $0x70] ss:$8 sps:$4 sm:$0xff]   ;;  %v435_v2 = vld [vmem:[#allocation6 + $0x64] ss:$8 sps:$4 sm:$0xff]   ;;  %v223_v42 = vlaneseq }
  0x2c   :  { %161 = vmatprep.subr.bf16.mxu0 %v432_v0  ;;  %v437_v3 = vld [vmem:[#allocation6 + $0x60] ss:$8 sps:$4 sm:$0xff]   ;;  %v438_v4 = vld [vmem:[#allocation6 + $0x54] ss:$8 sps:$4 sm:$0xff]   ;;  %v440_v7 = vld [vmem:[#allocation6 + $0x50] ss:$8 sps:$4 sm:$0xff]  }
  0x2d   :  { %162 = vmatpush1.bf16.xpose.msra.mxu0 %v434_v1  ;;  %v62_v5 = vld [vmem:[#allocation2 + $0x8] sm:$0xff]  ;;  %v441_v8 = vld [vmem:[#allocation6 + $0x44] ss:$8 sps:$4 sm:$0xff]   ;;  %v443_v9 = vld [vmem:[#allocation6 + $0x40] ss:$8 sps:$4 sm:$0xff]   ;;  %v571_v20 = vmov 0.0  }
  0x2e   :  { %163 = vmatprep.subr.bf16.mxu0 %v435_v2  ;;  %v64_v6 = vpack.c.bf16 %v62_v5, %v62_v5  ;;  %v444_v10 = vld [vmem:[#allocation6 + $0x34] ss:$8 sps:$4 sm:$0xff]   ;;  %v446_v11 = vld [vmem:[#allocation6 + $0x30] ss:$8 sps:$4 sm:$0xff]   ;;  %v447_v12 = vld [vmem:[#allocation6 + $0x24] ss:$8 sps:$4 sm:$0xff]   ;;  %411 = vmatprep.subr.mxu1 %v571_v20 }
  0x2f   :  { %v449_v13 = vld [vmem:[#allocation6 + $0x20] ss:$8 sps:$4 sm:$0xff]   ;;  %v450_v14 = vld [vmem:[#allocation6 + $0x14] ss:$8 sps:$4 sm:$0xff]   ;;  %v452_v15 = vld [vmem:[#allocation6 + $0x10] ss:$8 sps:$4 sm:$0xff]  }
  0x30   :  { %193 = vmatprep.mubr.bf16.mxu0 %v64_v6  ;;  %v453_v16 = vld [vmem:[#allocation6 + $0x4] ss:$8 sps:$4 sm:$0xff]   ;;  %v455_v17 = vld [vmem:[#allocation6] ss:$8 sps:$4 sm:$0xff]   ;;  %v61_v18 = vld [vmem:[#allocation2] sm:$0xff]  ;;  %vm572_vm0 = vmmov 0  }
  0x31   :  { %v63_v19 = vpack.c.bf16 %v61_v18, %v61_v18  ;;  %413 = vmatprep.mubr.msk.f32.mxu1 %vm572_vm0, %v571_v20  ;;  %v224_v43 = vshrl.u32 %v223_v42, 7  ;;  %v218_v44 = vld [vmem:[%s632_s2] sm:$0x1]  ;;  %v407_v49 = vld [vmem:[%s632_s2 + $0x1] ss:$0 sm:$0xff]  ;;  %v573_v53 = vmov 1.0  }
  0x32   :  { %vm317_vm2 = vcmask 57344   ;;  %s574_s12 = smov [#allocation9]  }
  0x33   :  { %v225_v45 = vsub.s32 0, %v224_v43  ;;  %s366_s13 = sshll.u32 %s574_s12, 4  ;;  %s367_s13 = int_to_ptr.vmem [resolvable:$true] %s366_s13 }
  0x34   :  { %s516_s14 = scalar_lea.vmem %s367_s13, 128  ;;  %p521_p2 = scmp.lt.s32.totalorder %s367_s13, %s367_s13 }
  0x35   :  { %164 = vmatpush1.bf16.xpose.msra.mxu0 %v437_v3  ;;  %p517_p1 = scmp.ne.s32.totalorder %s367_s13, %s516_s14  ;;  %p522_p3 = scmp.lt.s32.totalorder %s516_s14, %s516_s14 }
  0x36   :  { %165 = vmatprep.subr.bf16.mxu0 %v438_v4 }
  0x37   :  { %p523_p4 = por %p522_p3, %p521_p2 }
  0x39   :  { %p524_p5 = pnand %p523_p4, %p517_p1 }
  0x3d   :  { %166 = vmatpush1.bf16.xpose.msra.mxu0 %v440_v7 }
  0x3e   :  { %167 = vmatprep.subr.bf16.mxu0 %v441_v8 }
  0x45   :  { %168 = vmatpush1.bf16.xpose.msra.mxu0 %v443_v9 }
  0x46   :  { %169 = vmatprep.subr.bf16.mxu0 %v444_v10 }
  0x4d   :  { %170 = vmatpush1.bf16.xpose.msra.mxu0 %v446_v11 }
  0x4e   :  { %171 = vmatprep.subr.bf16.mxu0 %v447_v12 }
  0x55   :  { %172 = vmatpush1.bf16.xpose.msra.mxu0 %v449_v13 }
  0x56   :  { %173 = vmatprep.subr.bf16.mxu0 %v450_v14 }
  0x5d   :  { %174 = vmatpush1.bf16.xpose.msra.mxu0 %v452_v15 }
  0x5e   :  { %175 = vmatprep.subr.bf16.mxu0 %v453_v16 }
  0x65   :  { %176 = vmatpush1.bf16.xpose.msra.mxu0 %v455_v17 }
  0x6c   :  { %194 = vmatmul.mubr.bf16.vlgmr.msra.gmra.mxu0 %v63_v19 }
 0x12c   :  { %v195_v21 = vpop.f32.mrf.mxu0 }
 0x12d   :  { %v201_v22 = vrot.slane %v195_v21, 4 }
 0x12e   :  { %v197_v23 = vpop.f32.mrf.mxu0 }
 0x12f   :  { %v202_v24 = vadd.f32 %v201_v22, %v195_v21 }
 0x130   :  { %v198_v25 = vpop.f32.mrf.mxu0 }
 0x131   :  { %v203_v26 = vrot.slane %v202_v24, 2 }
 0x132   :  { %v199_v27 = vpop.f32.mrf.mxu0 }
 0x133   :  { %v204_v28 = vadd.f32 %v203_v26, %v202_v24 }
 0x135   :  { %v205_v29 = vrot.slane %v204_v28, 1 }
 0x137   :  { %v206_v30 = vadd.f32 %v205_v29, %v204_v28 }
 0x139   :  { %v208_v31 = vmul.f32 0.125, %v206_v30 }
 0x13b   :  { %v209_v32 = vsub.f32 %v195_v21, %v208_v31 }
 0x13d   :  { %v210_v33 = vmul.f32 %v209_v32, %v209_v32 }
 0x13f   :  { %v211_v34 = vrot.slane %v210_v33, 4 }
 0x141   :  { %v212_v35 = vadd.f32 %v211_v34, %v210_v33 }
 0x143   :  { %v213_v36 = vrot.slane %v212_v35, 2 }
 0x145   :  { %v214_v37 = vadd.f32 %v213_v36, %v212_v35 }
 0x147   :  { %v215_v38 = vrot.slane %v214_v37, 1 }
 0x149   :  { %v216_v39 = vadd.f32 %v215_v38, %v214_v37 }
 0x14b   :  { %v217_v40 = vmul.f32 0.125, %v216_v39 }
 0x14d   :  { %v220_v41 = vadd.f32 1e-05, %v217_v40 }
 0x14f   :  { %456 = vrsqrt.f32 %v220_v41 }
 0x15c   :  { %v457_v46 = vpop.eup %456 }
 0x15d   :  { %v222_v47 = vmul.f32 %v457_v46, %v218_v44 }
 0x15f   :  { %v226_v48 = vrot.slane %v222_v47, %v225_v45 }
 0x161   :  { %v227_v50 = vmul.f32 %v226_v48, %v209_v32 }
 0x163   :  { %v232_v51 = vadd.f32 %v407_v49, %v227_v50 }
 0x165   :  { %v233_v52 = vmul.f32 %v232_v51, %v232_v51 }
 0x167   :  { %234 = vadd.xlane.f32.xlu1 %v233_v52  ;;  %412 = vmatpush3.xpose.msra.mxu1 %v233_v52 }
 0x16a   :  { %414 = vmatmul.mubr.f32.vlgmr.msra.gmra.mxu1 %v573_v53 }
 0x1f0   :  { %v235_v54 = vpop.xlane.xlu1 %234 }
 0x1f1   :  { %v236_v55 = vmax.f32 %v235_v54, 1e-24 }
 0x1f3   :  { %458 = vrsqrt.f32 %v236_v55 }
 0x200   :  { %v459_v56 = vpop.eup %458 }
 0x201   :  { %v238_v57 = vmul.f32 %v459_v56, %v232_v51 }
 0x203   :  { %239 = vst [vmem:[#allocation9] sm:$0xff] %v238_v57 }
 0x22a   :  { %v306_v58 = vpop.f32.mrf.mxu1 }
 0x22b   :  { %460 = vrsqrt.f32 %v306_v58  ;;  %vm312_vm1 = vcmp.eq.f32.partialorder %v306_v58, inf  ;;  %v315_v62 = vand.u32 2147483648, %v306_v58  ;;  %vm314_vm3 = vcmp.eq.f32.partialorder %v306_v58, 0.0 }
 0x22c   :  { %v415_v59 = vpop.f32.mrf.mxu1 }
 0x238   :  { %v461_v60 = vpop.eup %460 }
 0x239   :  { %v311_v61 = vmul.f32 %v461_v60, %v306_v58 }
 0x23b   :  { %v313_v63 = vsel %vm312_vm1, %v306_v58, %v311_v61 }
 0x23c   :  { %v316_v0 = vsel %vm314_vm3, %v315_v62, %v313_v63 }
 0x23d   :  { %v318_v1 = vsel %vm317_vm2, %v316_v0, 0.0 }
 0x23e   :  { %319 = vadd.xlane.f32.xlu0 %v318_v1 }
 0x2c7   :  { %v320_v2 = vpop.xlane.xlu0 %319 }
 0x2c8   :  { %v321_v3 = vrot.slane %v320_v2, 4 }
 0x2ca   :  { %v322_v4 = vadd.f32 %v321_v3, %v320_v2 }
 0x2cc   :  { %v323_v5 = vrot.slane %v322_v4, 2 }
 0x2ce   :  { %v324_v6 = vadd.f32 %v323_v5, %v322_v4 }
 0x2d0   :  { %v325_v7 = vrot.slane %v324_v6, 1 }
 0x2d2   :  { %v326_v8 = vadd.f32 %v325_v7, %v324_v6 }
 0x2d4   :  { %416 = vpush %v326_v8 }
 0x305   :  { %s417_s2 = spop %416 }
 0x306   :  { %s330_s11 = smul.f32 0.125, %s417_s2 }
 0x308   :  { %v331_v9 = vstv %s330_s11 }
 0x309   :  { %v332_v10 = vsub.f32 %v316_v0, %v331_v9 }
 0x30b   :  { %v333_v11 = vmul.f32 %v332_v10, %v332_v10 }
 0x30d   :  { %v334_v12 = vsel %vm317_vm2, %v333_v11, 0.0 }
 0x30e   :  { %335 = vadd.xlane.f32.xlu0 %v334_v12 }
 0x397   :  { %v336_v13 = vpop.xlane.xlu0 %335 }
 0x398   :  { %v337_v14 = vrot.slane %v336_v13, 4 }
 0x39a   :  { %v338_v15 = vadd.f32 %v337_v14, %v336_v13 }
 0x39c   :  { %v339_v16 = vrot.slane %v338_v15, 2 }
 0x39e   :  { %v340_v17 = vadd.f32 %v339_v16, %v338_v15 }
 0x3a0   :  { %v341_v18 = vrot.slane %v340_v17, 1 }
 0x3a1   :  { %527 = shalt.err (!%p524_p5)
}
 0x3a2   :  { %369 = dma.vmem_to_hbm [thread:$0]  %s367_s13, 128, %s634_s4, [#allocation4]   ;;  %v342_v19 = vadd.f32 %v341_v18, %v340_v17 }
 0x3a3   :  { %s353_s20 = sld [smem:[#allocation8]]  ;;  %s575_s23 = smov [#allocation10]  }
 0x3a4   :  { %418 = vpush %v342_v19  ;;  %s408_s21 = sld [smem:[#allocation8 + $0x1]]  ;;  %s376_s24 = sshll.u32 %s575_s23, 4  ;;  %s377_s24 = int_to_ptr.vmem [resolvable:$true] %s376_s24 }
 0x3a5   :  { %s536_s4 = scalar_lea.vmem %s377_s24, 16  ;;  %s540_s25 = scalar_lea.vmem %s377_s24, 32 }
 0x3a6   :  { %p537_p6 = scmp.ne.s32.totalorder %s377_s24, %s536_s4  ;;  %p541_p7 = scmp.lt.s32.totalorder %s377_s24, %s377_s24 }
 0x3a7   :  { %p542_p8 = scmp.lt.s32.totalorder %s540_s25, %s536_s4 }
 0x3a9   :  { %v354_v23 = vstv %s353_s20  ;;  %p543_p9 = por %p542_p8, %p541_p7 }
 0x3aa   :  { %v357_v25 = vstv %s408_s21 }
 0x3ab   :  { %p544_p10 = pnand %p543_p9, %p537_p6 }
 0x3d5   :  { %s419_s17 = spop %418 }
 0x3d6   :  { %s346_s18 = smul.f32 0.125, %s419_s17 }
 0x3d8   :  { %s347_s19 = sadd.f32 1e-05, %s346_s18 }
 0x3da   :  { %v348_v20 = vstv %s347_s19 }
 0x3db   :  { %462 = vrsqrt.f32 %v348_v20 }
 0x3e8   :  { %v463_v21 = vpop.eup %462 }
 0x3e9   :  { %420 = vpush %v463_v21 }
 0x41a   :  { %s421_s22 = spop %420 }
 0x41b   :  { %v351_v22 = vstv %s421_s22 }
 0x41c   :  { %v352_v24 = vmul.f32 %v351_v22, %v332_v10 }
 0x41e   :  { %v355_v26 = vmul.f32 %v354_v23, %v352_v24 }
 0x420   :  { %v358_v27 = vadd.f32 %v357_v25, %v355_v26 }
 0x422   :  { %359 = vst.msk [vmem:[#allocation10] sm:$0x1] %vm317_vm2, %v358_v27 }
 0x423   :  { %547 = shalt.err (!%p544_p10)
}
 0x424   :  { %379 = dma.vmem_to_hbm [thread:$0]  %s377_s24, 16, %s635_s5, [#allocation11]  }
 0x425   :  { %562 = dma.done.wait [#allocation4], 128  }
 0x426   :  { %563 = vsyncadd [#allocation4], 4294967168 }
 0x427   :  { %564 = dma.done.wait [#allocation11], 16  }
 0x428   :  { %565 = vsyncadd [#allocation11], 4294967280 }
 0x429   :  { %386 = vsyncpa [#allocation3], 1 }
 0x42a   :  { %387 = vsyncpa [#allocation7], 1 }
 0x42b   :  { %388 = vsyncpa [#allocation4], 1 }
 0x42c   :  { %389 = vsyncpa [#allocation11], 1 }
 0x42d   :  { %390 = vsyncpa [#allocation5], 1 }

</bundles_post_ra>
